<compile_context>
chip_gen: v7x
topology: tpu7x:2x2x1
jax: 0.10.0
libtpu: 0.0.40
codegen_flags: <defaults>
</compile_context>

<pallas_src>
import functools

import jax
import jax.numpy as jnp
from jax.experimental import pallas as pl
from jax.experimental.pallas import tpu as pltpu

_LANE = 128
_SUBLANE = 8
_TARGET_X_BLOCK_BYTES = 8 << 20   # ~8 MiB x block per pipeline buffer
_MAX_TILE_B = 4096                # rows per batch tile (keeps worst-case VMEM tame)
_MAX_TILE_F = 4096                # beyond this, tile the reduction (F) axis too


def _round_up(n, m):
    return ((n + m - 1) // m) * m


def _choose_tiles(batch, features, itemsize):
    """Pick (tile_b, tile_f) so one x block is ~_TARGET_X_BLOCK_BYTES.

    tile_f == features whenever F fits a single block (common case, no
    reduction-axis tiling); otherwise F is tiled in 128-lane multiples and the
    kernel accumulates across F blocks.
    """
    tile_f = features if features <= _MAX_TILE_F else _MAX_TILE_F
    row_bytes = max(1, _round_up(tile_f, _LANE) * itemsize)
    rows = _TARGET_X_BLOCK_BYTES // row_bytes
    tile_b = min(_MAX_TILE_B, _round_up(batch, _SUBLANE),
                 (rows // _SUBLANE) * _SUBLANE)
    tile_b = max(_SUBLANE, tile_b)
    return tile_b, tile_f


def _vmem_limit_bytes(tile_b, tile_f, itemsize):
    """Scoped-VMEM limit consistent with the chosen tiles."""
    lanes_f = _round_up(tile_f, _LANE)
    x_block = tile_b * lanes_f * itemsize          # (tile_b, tile_f) input block
    w_block = _SUBLANE * lanes_f * 4               # (1, tile_f) pads to 8 sublanes
    out_block = tile_b * _LANE * 4                 # (tile_b, 1) pads to full lane tiles
    acc_scratch = tile_b * _LANE * 4               # (tile_b, 1) f32 accumulator
    reduce_temps = 4 * tile_b * _LANE * 4          # live (tile_b, 128) f32 values
    need = 2 * (x_block + w_block + out_block) + acc_scratch + reduce_temps
    need = need + need // 4 + (4 << 20)            # Mosaic internal-scratch headroom
    return int(min(48 << 20, max(32 << 20, need)))


def _partial_row_dot(x_ref, w_ref, *, features, lane_chunk=_LANE):
    """f32 per-row dot of the current (tile_b, tile_f) block with the (1, tile_f)
    weight row.  128-lane chunks are combined with VPU multiplies/adds and only a
    single cross-lane (XLU) reduce per 8 rows is issued; the full block product is
    never materialized.  Tail lanes of a partial last F block are masked out."""
    tile_b, tile_f = x_ref.shape
    need_mask = (features % tile_f) != 0           # only when F is tiled unevenly
    f_base = pl.program_id(1) * tile_f if need_mask else 0

    def chunk(start, width):
        xc = x_ref[:, pl.ds(start, width)].astype(jnp.float32)
        wc = w_ref[:, pl.ds(start, width)].astype(jnp.float32)
        p = xc * wc
        if need_mask:
            lane = jax.lax.broadcasted_iota(jnp.int32, (tile_b, width), 1)
            p = jnp.where(f_base + start + lane < features, p, 0.0)
        return p

    n_full = tile_f // lane_chunk
    rem = tile_f - n_full * lane_chunk
    y = None
    if n_full:
        acc = chunk(0, lane_chunk)
        for j in range(1, n_full):                 # short static unroll (F / 128)
            acc = acc + chunk(j * lane_chunk, lane_chunk)
        y = jnp.sum(acc, axis=-1, keepdims=True)   # one XLU reduce per 8 rows
    if rem:
        tail = jnp.sum(chunk(n_full * lane_chunk, rem), axis=-1, keepdims=True)
        y = tail if y is None else y + tail
    return y                                       # (tile_b, 1) f32


def _ontop_qs_kernel(x_ref, w_ref, b_ref, o_ref, acc_ref, *, features):
    # x_ref:   (tile_b, tile_f) VMEM activation block
    # w_ref:   (1, tile_f)      lane-dense weight row block
    # b_ref:   (1, 1)           SMEM f32 bias scalar
    # o_ref:   (tile_b, 1)      output block (resident across the F axis)
    # acc_ref: (tile_b, 1)      f32 VMEM accumulator scratch
    k = pl.program_id(1)

    @pl.when(k == 0)
    def _init():
        acc_ref[...] = jnp.zeros_like(acc_ref)

    acc_ref[...] += _partial_row_dot(x_ref, w_ref, features=features)

    # Write (running sum + bias) every step; the output block index is constant
    # over k, so only the final k's value is flushed to HBM (P3 accumulator).
    o_ref[...] = (acc_ref[...] + b_ref[0, 0]).astype(o_ref.dtype)


@functools.partial(jax.jit, static_argnames=("tile_b", "tile_f"))
def ontop_qs(x, weight, bias, *, tile_b=None, tile_f=None):
    """OnTopQS forward: y = x @ weight.T + bias.

    x: (B, F); weight: (1, F) (PyTorch nn.Linear layout); bias: (1,) -> (B, 1).
    bf16 x is supported as-is (upcast to f32 in-register, f32 accumulation).
    """
    B, F = x.shape
    if tile_b is None or tile_f is None:
        auto_b, auto_f = _choose_tiles(B, F, x.dtype.itemsize)
        tile_b = tile_b or auto_b
        tile_f = tile_f or auto_f

    grid = (pl.cdiv(B, tile_b), pl.cdiv(F, tile_f))   # no input padding needed

    w_row = weight.reshape(1, F)                      # lane-dense weight row
    b = bias.reshape(1, 1).astype(jnp.float32)        # SMEM scalar

    kernel = functools.partial(_ontop_qs_kernel, features=F)

    return pl.pallas_call(
        kernel,
        out_shape=jax.ShapeDtypeStruct((B, 1), x.dtype),
        grid_spec=pltpu.PrefetchScalarGridSpec(
            num_scalar_prefetch=0,
            grid=grid,
            in_specs=[
                pl.BlockSpec((tile_b, tile_f), lambda i, k: (i, k)),   # stream x
                pl.BlockSpec((1, tile_f), lambda i, k: (0, k)),        # weight row
                pl.BlockSpec(memory_space=pltpu.MemorySpace.SMEM),     # bias
            ],
            out_specs=pl.BlockSpec((tile_b, 1), lambda i, k: (i, 0)),
            scratch_shapes=[pltpu.VMEM((tile_b, 1), jnp.float32)],
        ),
        compiler_params=pltpu.CompilerParams(
            # Batch tiles are independent ("parallel"); F is a reduction
            # ("arbitrary", innermost).  See header note re: CORE_PARALLEL on v7x.
            dimension_semantics=("parallel", "arbitrary"),
            vmem_limit_bytes=_vmem_limit_bytes(tile_b, tile_f, x.dtype.itemsize),
        ),
    )(x, w_row, b)


if __name__ == "__main__":
    key = jax.random.PRNGKey(0)
    k_x, k_w, k_b = jax.random.split(key, 3)

    # nn.Linear(512, 1) default; odd batch exercises the un-padded ragged path.
    batch, num_features = 13, 512

    # Deterministic PyTorch-style init: U(-1/sqrt(F), 1/sqrt(F))
    bound = float(num_features) ** -0.5
    weight = jax.random.uniform(k_w, (1, num_features), jnp.float32, -bound, bound)
    bias = jax.random.uniform(k_b, (1,), jnp.float32, -bound, bound)
    x = jax.random.normal(k_x, (batch, num_features), jnp.float32)

    # Exact-f32 reference (elementwise + reduce; avoids MXU precision ambiguity).
    ref = jnp.sum(x * weight, axis=-1, keepdims=True) + bias

    # 1) Auto-tiled path (single F block, partial batch block, no padding).
    out = jax.block_until_ready(ontop_qs(x, weight, bias))
    assert out.shape == (batch, 1)
    assert jnp.allclose(out, ref, atol=1e-4, rtol=1e-5), float(
        jnp.max(jnp.abs(out - ref)))

    # 2) Forced tiny tiles: exercises the 2-D (batch x reduction) grid, the f32
    #    accumulator init/accumulate across F blocks, and the ragged last batch
    #    block -- all at small shapes.
    out_tiled = jax.block_until_ready(ontop_qs(x, weight, bias, tile_b=8, tile_f=128))
    assert jnp.allclose(out_tiled, ref, atol=1e-4, rtol=1e-5), float(
        jnp.max(jnp.abs(out_tiled - ref)))

    print("KERNEL_OK")
</pallas_src>

<mosaic_0001>
module attributes {stable_mosaic.version = 11 : i64} {
  func.func @_ontop_qs_kernel(%arg0: i32, %arg1: i32, %arg2: memref<16x512xf32, #tpu.memory_space<vmem>>, %arg3: memref<1x512xf32, #tpu.memory_space<vmem>>, %arg4: memref<1x1xf32, #tpu.memory_space<smem>>, %arg5: memref<16x1xf32, #tpu.memory_space<vmem>>, %arg6: memref<16x1xf32, #tpu.memory_space<vmem>>) attributes {dimension_semantics = [#tpu.dimension_semantics<parallel>, #tpu.dimension_semantics<arbitrary>], iteration_bounds = array<i64: 1, 1>, scalar_prefetch = 0 : i64, scratch_operands = 1 : i64, tpu.core_type = #tpu.core_type<tc>, window_params = [{transform_indices = @transform_0, window_bounds = array<i64: 16, 512>}, {transform_indices = @transform_1, window_bounds = array<i64: 1, 512>}, {transform_indices = @transform_2, window_bounds = array<i64: 1, 1>}, {transform_indices = @transform_3, window_bounds = array<i64: 16, 1>}]} {
    %c0_i32 = arith.constant 0 : i32
    %0 = arith.cmpi eq, %arg1, %c0_i32 : i32
    %1 = arith.extui %0 : i1 to i32
    %c0_i32_0 = arith.constant 0 : i32
    %2 = arith.cmpi ne, %1, %c0_i32_0 : i32
    scf.if %2 {
      %cst_23 = arith.constant 0.000000e+00 : f32
      %32 = vector.broadcast %cst_23 : f32 to vector<16x1xf32>
      %c0_24 = arith.constant 0 : index
      %c0_25 = arith.constant 0 : index
      %33 = vector.load %arg6[%c0_24, %c0_25] : memref<16x1xf32, #tpu.memory_space<vmem>>, vector<16x1xf32>
      tpu.vector_store %arg6[%c0_24, %c0_25], %32 {strides = array<i32>} : memref<16x1xf32, #tpu.memory_space<vmem>>, vector<16x1xf32>,
    } else {
    }
    %c0 = arith.constant 0 : index
    %c0_1 = arith.constant 0 : index
    %3 = vector.load %arg6[%c0, %c0_1] : memref<16x1xf32, #tpu.memory_space<vmem>>, vector<16x1xf32>
    %c0_2 = arith.constant 0 : index
    %c0_3 = arith.constant 0 : index
    %4 = vector.load %arg2[%c0_2, %c0_3] : memref<16x512xf32, #tpu.memory_space<vmem>>, vector<16x128xf32>
    %c0_4 = arith.constant 0 : index
    %c0_5 = arith.constant 0 : index
    %5 = vector.load %arg3[%c0_4, %c0_5] : memref<1x512xf32, #tpu.memory_space<vmem>>, vector<1x128xf32>
    %6 = vector.broadcast %5 : vector<1x128xf32> to vector<16x128xf32>
    %7 = arith.mulf %4, %6 : vector<16x128xf32>
    %c0_6 = arith.constant 0 : index
    %c128 = arith.constant 128 : index
    %8 = vector.load %arg2[%c0_6, %c128] : memref<16x512xf32, #tpu.memory_space<vmem>>, vector<16x128xf32>
    %c0_7 = arith.constant 0 : index
    %c128_8 = arith.constant 128 : index
    %9 = vector.load %arg3[%c0_7, %c128_8] : memref<1x512xf32, #tpu.memory_space<vmem>>, vector<1x128xf32>
    %10 = vector.broadcast %9 : vector<1x128xf32> to vector<16x128xf32>
    %11 = arith.mulf %8, %10 : vector<16x128xf32>
    %12 = arith.addf %7, %11 : vector<16x128xf32>
    %c0_9 = arith.constant 0 : index
    %c256 = arith.constant 256 : index
    %13 = vector.load %arg2[%c0_9, %c256] : memref<16x512xf32, #tpu.memory_space<vmem>>, vector<16x128xf32>
    %c0_10 = arith.constant 0 : index
    %c256_11 = arith.constant 256 : index
    %14 = vector.load %arg3[%c0_10, %c256_11] : memref<1x512xf32, #tpu.memory_space<vmem>>, vector<1x128xf32>
    %15 = vector.broadcast %14 : vector<1x128xf32> to vector<16x128xf32>
    %16 = arith.mulf %13, %15 : vector<16x128xf32>
    %17 = arith.addf %12, %16 : vector<16x128xf32>
    %c0_12 = arith.constant 0 : index
    %c384 = arith.constant 384 : index
    %18 = vector.load %arg2[%c0_12, %c384] : memref<16x512xf32, #tpu.memory_space<vmem>>, vector<16x128xf32>
    %c0_13 = arith.constant 0 : index
    %c384_14 = arith.constant 384 : index
    %19 = vector.load %arg3[%c0_13, %c384_14] : memref<1x512xf32, #tpu.memory_space<vmem>>, vector<1x128xf32>
    %20 = vector.broadcast %19 : vector<1x128xf32> to vector<16x128xf32>
    %21 = arith.mulf %18, %20 : vector<16x128xf32>
    %22 = arith.addf %17, %21 : vector<16x128xf32>
    %cst = arith.constant dense<0.000000e+00> : vector<16xf32>
    %23 = vector.multi_reduction <add>, %22, %cst [1] : vector<16x128xf32> to vector<16xf32>
    %24 = vector.shape_cast %23 : vector<16xf32> to vector<16x1xf32>
    %25 = arith.addf %3, %24 : vector<16x1xf32>
    %c0_15 = arith.constant 0 : index
    %c0_16 = arith.constant 0 : index
    %26 = vector.load %arg6[%c0_15, %c0_16] : memref<16x1xf32, #tpu.memory_space<vmem>>, vector<16x1xf32>
    tpu.vector_store %arg6[%c0_15, %c0_16], %25 {strides = array<i32>} : memref<16x1xf32, #tpu.memory_space<vmem>>, vector<16x1xf32>,
    %c0_17 = arith.constant 0 : index
    %c0_18 = arith.constant 0 : index
    %27 = vector.load %arg6[%c0_17, %c0_18] : memref<16x1xf32, #tpu.memory_space<vmem>>, vector<16x1xf32>
    %c0_19 = arith.constant 0 : index
    %c0_20 = arith.constant 0 : index
    %28 = memref.load %arg4[%c0_19, %c0_20] : memref<1x1xf32, #tpu.memory_space<smem>>
    %29 = vector.broadcast %28 : f32 to vector<16x1xf32>
    %30 = arith.addf %27, %29 : vector<16x1xf32>
    %c0_21 = arith.constant 0 : index
    %c0_22 = arith.constant 0 : index
    %31 = vector.load %arg5[%c0_21, %c0_22] : memref<16x1xf32, #tpu.memory_space<vmem>>, vector<16x1xf32>
    tpu.vector_store %arg5[%c0_21, %c0_22], %30 {strides = array<i32>} : memref<16x1xf32, #tpu.memory_space<vmem>>, vector<16x1xf32>,
    return
  }
  func.func @transform_0(%arg0: i32, %arg1: i32) -> (i32, i32) {
    %c0_i32 = arith.constant 0 : i32
    return %arg0, %arg1 : i32, i32
  }
  func.func @transform_1(%arg0: i32, %arg1: i32) -> (i32, i32) {
    %c0_i32 = arith.constant 0 : i32
    %c0_i32_0 = arith.constant 0 : i32
    return %c0_i32, %arg1 : i32, i32
  }
  func.func @transform_2(%arg0: i32, %arg1: i32) -> (i32, i32) {
    %c0_i32 = arith.constant 0 : i32
    %c0_i32_0 = arith.constant 0 : i32
    %c0_i32_1 = arith.constant 0 : i32
    return %c0_i32, %c0_i32_0 : i32, i32
  }
  func.func @transform_3(%arg0: i32, %arg1: i32) -> (i32, i32) {
    %c0_i32 = arith.constant 0 : i32
    %c0_i32_0 = arith.constant 0 : i32
    return %arg0, %c0_i32 : i32, i32
  }
}

</mosaic_0001>

<bundles_post_ra>
// kernel: ontop_qs.1
= control target key start
LH: loop header
LB: loop body
LE: loop exit
PB: predicated region body
PF: predicated region fallthrough
CT: control target
= control target key end

     0   :  { %9 = vsyncpa [#allocation5], 0  ;;  %s142_s12 = smov [#allocation4]   ;;  %s205_s0 = inlined_call_operand.hbm [shape: f32[13,512], index: 0, kind: input, shape index: {}]   ;;  %s206_s1 = inlined_call_operand.vmem [shape: f32[1,512], index: 1, kind: input, shape index: {}]   ;;  %s207_s2 = inlined_call_operand.<no memory space> [shape: f32[1,1], index: 2, kind: input, shape index: {}]   ;;  %s208_s3 = inlined_call_operand.vmem [shape: f32[13,1], index: 3, kind: output, shape index: {}]  }
   0x1   :  { %s15_s13 = sshll.u32 %s142_s12, 4  ;;  %s118_s16 = scalar_lea.hbm %s205_s0, 1024  ;;  %s16_s13 = int_to_ptr.vmem [resolvable:$true] %s15_s13 }
   0x2   :  { %p119_p0 = scmp.ne.s32.totalorder %s205_s0, %s118_s16  ;;  %p122_p1 = scmp.lt.u32.totalorder %s118_s16, %s205_s0 }
   0x4   :  { %p124_p2 = pnand %p122_p1, %p119_p0 }
   0x6   :  { %127 = shalt.err (!%p124_p2)
}
   0x7   :  { %s128_s21 = scalar_lea.vmem %s16_s13, 1024  ;;  %p133_p4 = scmp.lt.s32.totalorder %s16_s13, %s16_s13 }
   0x8   :  { %p129_p3 = scmp.ne.s32.totalorder %s16_s13, %s128_s21  ;;  %p134_p5 = scmp.lt.s32.totalorder %s128_s21, %s128_s21 }
   0xa   :  { %p135_p6 = por %p134_p5, %p133_p4 }
   0xc   :  { %p136_p7 = pnand %p135_p6, %p129_p3 }
   0xe   :  { %139 = shalt.err (!%p136_p7)
}
   0xf   :  { %s143_s22 = smov 512   ;;  %s144_s23 = smov 32  }
  0x10   :  { %21 = dma.hbm_to_vmem [thread:$0]  %s205_s0, 1024, %s16_s13, [#allocation5], %s143_s22, %s143_s22, %s144_s23  }
  0x11   :  { %140 = dma.done.wait [#allocation5], 1024  }
  0x12   :  { %141 = vsyncadd [#allocation5], 4294966272  ;;  %vm33_vm0 = vcmask 7168   ;;  %v145_v0 = vmov 0.0   ;;  %v38_v1 = vld [vmem:[#allocation4] sm:$0xff]  ;;  %v49_v3 = vld [vmem:[#allocation4 + $0x8] sm:$0xff]  ;;  %v100_v33 = vstv %s207_s2 }
  0x13   :  { %34 = vst.msk [vmem:[#allocation2] sm:$0xff] %vm33_vm0, %v145_v0  ;;  %35 = vst.msk [vmem:[#allocation2 + $0x8] sm:$0xff] %vm33_vm0, %v145_v0  ;;  %v110_v2 = vld [vmem:[%s206_s1] ss:$0 sm:$0xff]  ;;  %v111_v5 = vld [vmem:[%s206_s1 + $0x1] ss:$0 sm:$0xff] }
  0x14   :  { %v47_v4 = vmul.f32 %v110_v2, %v38_v1  ;;  %v62_v6 = vld [vmem:[#allocation4 + $0x10] sm:$0xff]  ;;  %v58_v8 = vmul.f32 %v111_v5, %v49_v3  ;;  %v75_v10 = vld [vmem:[#allocation4 + $0x18] sm:$0xff]  ;;  %v39_v12 = vld [vmem:[#allocation4 + $0x20] sm:$0xff] }
  0x15   :  { %v112_v7 = vld [vmem:[%s206_s1 + $0x2] ss:$0 sm:$0xff]  ;;  %v113_v11 = vld [vmem:[%s206_s1 + $0x3] ss:$0 sm:$0xff]  ;;  %v48_v13 = vmul.f32 %v110_v2, %v39_v12  ;;  %v50_v14 = vld [vmem:[#allocation4 + $0x28] sm:$0xff] }
  0x16   :  { %v71_v9 = vmul.f32 %v112_v7, %v62_v6  ;;  %v63_v15 = vld [vmem:[#allocation4 + $0x30] sm:$0xff]  ;;  %v76_v16 = vld [vmem:[#allocation4 + $0x38] sm:$0xff]  ;;  %v60_v17 = vadd.f32 %v58_v8, %v47_v4  ;;  %v84_v18 = vmul.f32 %v113_v11, %v75_v10  ;;  %v59_v19 = vmul.f32 %v111_v5, %v50_v14 }
  0x17   :  { %v72_v20 = vmul.f32 %v112_v7, %v63_v15  ;;  %v85_v23 = vmul.f32 %v113_v11, %v76_v16 }
  0x18   :  { %v73_v21 = vadd.f32 %v71_v9, %v60_v17  ;;  %v61_v22 = vadd.f32 %v59_v19, %v48_v13 }
  0x1a   :  { %v86_v24 = vadd.f32 %v84_v18, %v73_v21  ;;  %v74_v25 = vadd.f32 %v72_v20, %v61_v22  ;;  %v36_v27 = vld [vmem:[#allocation2] sm:$0xff]  ;;  %v37_v30 = vld [vmem:[#allocation2 + $0x8] sm:$0xff] }
  0x1c   :  { %88 = vadd.xlane.f32.xlu0 %v86_v24  ;;  %v87_v26 = vadd.f32 %v85_v23, %v74_v25 }
  0x20   :  { %90 = vadd.xlane.f32.xlu0 %v87_v26 }
  0xa9   :  { %v89_v28 = vpop.xlane.xlu0 %88 }
  0xaa   :  { %v92_v29 = vadd.f32 %v89_v28, %v36_v27 }
  0xac   :  { %95 = vst.msk [vmem:[#allocation2] sm:$0xff] %vm33_vm0, %v92_v29 }
  0xad   :  { %v91_v31 = vpop.xlane.xlu0 %90 }
  0xae   :  { %v93_v32 = vadd.f32 %v91_v31, %v37_v30 }
  0xb0   :  { %96 = vst.msk [vmem:[#allocation2 + $0x8] sm:$0xff] %vm33_vm0, %v93_v32 }
  0xb3   :  { %v97_v34 = vld [vmem:[#allocation2] sm:$0xff] }
  0xb4   :  { %v101_v35 = vadd.f32 %v100_v33, %v97_v34 }
  0xb6   :  { %103 = vst.msk [vmem:[%s208_s3] sm:$0xff] %vm33_vm0, %v101_v35 }
  0xb7   :  { %v98_v36 = vld [vmem:[#allocation2 + $0x8] sm:$0xff] }
  0xb8   :  { %v102_v37 = vadd.f32 %v100_v33, %v98_v36 }
  0xba   :  { %104 = vst.msk [vmem:[%s208_s3 + $0x8] sm:$0xff] %vm33_vm0, %v102_v37 }
  0xbb   :  { %109 = vsyncpa [#allocation5], 1 }

</bundles_post_ra>
